<compile_context>
chip_gen: v7x
topology: tpu7x:2x2x1
jax: 0.10.0
libtpu: 0.0.40
codegen_flags: <defaults>
</compile_context>

<pallas_src>
import functools
import math

import jax
import jax.numpy as jnp
from jax.experimental import pallas as pl
from jax.experimental.pallas import tpu as pltpu


def _pe_add_dropout_kernel(p_drop, apply_dropout,
                           seed_ref, x_ref, pe_ref, o_ref):
    """One (bt, N, D) tile: o = dropout(x + pe), pe is a (bt, D) table tile."""
    pe = pe_ref[...][:, None, :]                                # (bt, 1, D) -> broadcast over N
    val = x_ref[...].astype(jnp.float32) + pe

    if apply_dropout:
        # Per-tile seeded hardware PRNG; Bernoulli(keep = 1 - p) via uint32 threshold.
        # TODO(synk): dropout uses the TPU hardware PRNG, so the mask cannot bit-match
        # torch's RNG (semantics/scaling match nn.Dropout in training mode).
        pltpu.prng_seed(seed_ref[0], pl.program_id(0))
        bits = pltpu.bitcast(pltpu.prng_random_bits(val.shape), jnp.uint32)
        keep_thresh = jnp.uint32(
            min(int(round((1.0 - p_drop) * 4294967296.0)), 4294967295))
        keep = bits < keep_thresh
        val = jnp.where(keep, val * (1.0 / (1.0 - p_drop)), 0.0)

    o_ref[...] = val.astype(o_ref.dtype)


@functools.lru_cache(maxsize=8)
def _pe_table(T, D):
    """(T, D) sinusoidal table, exactly the torch buffer formula (f32)."""
    position = jnp.arange(T, dtype=jnp.float32)[:, None]
    div_term = jnp.exp(jnp.arange(0, D, 2, dtype=jnp.float32)
                       * (-math.log(10000.0) / D))
    pe = jnp.zeros((T, D), jnp.float32)
    pe = pe.at[:, 0::2].set(jnp.sin(position * div_term))
    pe = pe.at[:, 1::2].set(jnp.cos(position * div_term))
    return pe


def _choose_block_t(T, N, D, itemsize, budget_bytes=2 << 20, min_tiles=2):
    """Byte-budgeted t-tile: ~budget_bytes of x per tile (so double-buffered x + out
    tiles stay well under v5e's 16 MiB scoped-VMEM default), a multiple of 8 rows, and
    at least `min_tiles` grid steps so v7x's two TensorCores both get work."""
    if T <= 8:
        return T                                        # full extent (always legal)
    bt = max(8, (budget_bytes // (N * D * itemsize)) // 8 * 8)
    bt = min(bt, max(8, (T // min_tiles) // 8 * 8))
    return int(bt)


def sinusoidal_positional_encoding_pallas(x, *, dropout_p=0.1, training=False,
                                          seed=0, max_len=5000, block_t=None):
    """x: (T, N, D). Returns dropout(x + pe[:T]) with torch module semantics."""
    T, N, D = x.shape
    assert T <= max_len
    assert D % 2 == 0, "d_model must be even (same restriction as the torch module)"

    if block_t is None:
        block_t = _choose_block_t(T, N, D, jnp.dtype(x.dtype).itemsize)
    grid_t = pl.cdiv(T, block_t)

    pe = _pe_table(T, D)                                # tiny (T, D); never (T, N, D)
    seed_arr = jnp.asarray([seed], dtype=jnp.int32)

    apply_dropout = bool(training) and float(dropout_p) > 0.0
    kernel = functools.partial(_pe_add_dropout_kernel, float(dropout_p), apply_dropout)

    return pl.pallas_call(
        kernel,
        out_shape=jax.ShapeDtypeStruct((T, N, D), x.dtype),
        grid_spec=pltpu.PrefetchScalarGridSpec(
            num_scalar_prefetch=1,
            grid=(grid_t,),
            in_specs=[
                pl.BlockSpec((block_t, N, D), lambda i, s: (i, 0, 0)),   # x tile
                pl.BlockSpec((block_t, D), lambda i, s: (i, 0)),         # pe tile (t only)
            ],
            out_specs=pl.BlockSpec((block_t, N, D), lambda i, s: (i, 0, 0)),
        ),
        compiler_params=pltpu.CompilerParams(dimension_semantics=("parallel",)),
    )(seed_arr, x, pe)


def _reference(x):
    """Pure-JAX transcription of the torch module (eval mode: dropout = identity)."""
    T, N, D = x.shape
    position = jnp.arange(T, dtype=jnp.float32)[:, None]
    div_term = jnp.exp(jnp.arange(0, D, 2, dtype=jnp.float32) * (-math.log(10000.0) / D))
    pe = jnp.zeros((T, 1, D), jnp.float32)
    pe = pe.at[:, 0, 0::2].set(jnp.sin(position * div_term))
    pe = pe.at[:, 0, 1::2].set(jnp.cos(position * div_term))
    return x + pe


if __name__ == "__main__":
    # Small shapes consistent with the module: (seq_len, batch, d_model)
    T, N, D = 16, 8, 128
    dropout_p = 0.1

    key = jax.random.PRNGKey(0)
    x = jax.random.normal(key, (T, N, D), dtype=jnp.float32)

    # Eval mode (dropout = identity): must match the torch formula.
    out = jax.block_until_ready(
        sinusoidal_positional_encoding_pallas(x, dropout_p=dropout_p, training=False))
    ref = _reference(x)
    assert out.shape == (T, N, D)
    assert jnp.allclose(out, ref, atol=1e-5, rtol=1e-5), \
        float(jnp.max(jnp.abs(out - ref)))

    # Training mode uses the TPU hardware PRNG, which has no CPU/interpret lowering,
    # so only exercise it when a real TPU backend is present.
    if jax.devices()[0].platform == "tpu":
        out_tr = jax.block_until_ready(
            sinusoidal_positional_encoding_pallas(x, dropout_p=dropout_p, training=True,
                                                  seed=123))
        drop_frac = float(jnp.mean(out_tr == 0.0))
        assert 0.02 < drop_frac < 0.25, drop_frac
        scaled = ref / (1.0 - dropout_p)
        kept_err = jnp.where(out_tr == 0.0, 0.0, jnp.abs(out_tr - scaled))
        assert float(jnp.max(kept_err)) < 1e-3, float(jnp.max(kept_err))

    print("KERNEL_OK")
</pallas_src>

<mosaic_0001>
module attributes {stable_mosaic.version = 11 : i64} {
  func.func @_pe_add_dropout_kernel(%arg0: i32, %arg1: memref<1xi32, #tpu.memory_space<smem>>, %arg2: memref<8x8x128xf32, #tpu.memory_space<vmem>>, %arg3: memref<8x128xf32, #tpu.memory_space<vmem>>, %arg4: memref<8x8x128xf32, #tpu.memory_space<vmem>>) attributes {dimension_semantics = [#tpu.dimension_semantics<parallel>], iteration_bounds = array<i64: 2>, scalar_prefetch = 1 : i64, scratch_operands = 0 : i64, tpu.core_type = #tpu.core_type<tc>, window_params = [{transform_indices = @transform_0, window_bounds = array<i64: 8, 8, 128>}, {transform_indices = @transform_1, window_bounds = array<i64: 8, 128>}, {transform_indices = @transform_2, window_bounds = array<i64: 8, 8, 128>}]} {
    %c0 = arith.constant 0 : index
    %c0_0 = arith.constant 0 : index
    %0 = vector.load %arg3[%c0, %c0_0] : memref<8x128xf32, #tpu.memory_space<vmem>>, vector<8x128xf32>
    %1 = vector.shape_cast %0 : vector<8x128xf32> to vector<8x1x128xf32>
    %c0_1 = arith.constant 0 : index
    %c0_2 = arith.constant 0 : index
    %c0_3 = arith.constant 0 : index
    %2 = vector.load %arg2[%c0_1, %c0_2, %c0_3] : memref<8x8x128xf32, #tpu.memory_space<vmem>>, vector<8x8x128xf32>
    %3 = vector.broadcast %1 : vector<8x1x128xf32> to vector<8x8x128xf32>
    %4 = arith.addf %2, %3 : vector<8x8x128xf32>
    %c0_4 = arith.constant 0 : index
    %c0_5 = arith.constant 0 : index
    %c0_6 = arith.constant 0 : index
    %5 = vector.load %arg4[%c0_4, %c0_5, %c0_6] : memref<8x8x128xf32, #tpu.memory_space<vmem>>, vector<8x8x128xf32>
    tpu.vector_store %arg4[%c0_4, %c0_5, %c0_6], %4 {strides = array<i32>} : memref<8x8x128xf32, #tpu.memory_space<vmem>>, vector<8x8x128xf32>,
    return
  }
  func.func @transform_0(%arg0: i32, %arg1: memref<1xi32, #tpu.memory_space<smem>>) -> (i32, i32, i32) {
    %c0_i32 = arith.constant 0 : i32
    %c0_i32_0 = arith.constant 0 : i32
    %c0_i32_1 = arith.constant 0 : i32
    return %arg0, %c0_i32, %c0_i32_0 : i32, i32, i32
  }
  func.func @transform_1(%arg0: i32, %arg1: memref<1xi32, #tpu.memory_space<smem>>) -> (i32, i32) {
    %c0_i32 = arith.constant 0 : i32
    %c0_i32_0 = arith.constant 0 : i32
    return %arg0, %c0_i32 : i32, i32
  }
  func.func @transform_2(%arg0: i32, %arg1: memref<1xi32, #tpu.memory_space<smem>>) -> (i32, i32, i32) {
    %c0_i32 = arith.constant 0 : i32
    %c0_i32_0 = arith.constant 0 : i32
    %c0_i32_1 = arith.constant 0 : i32
    return %arg0, %c0_i32, %c0_i32_0 : i32, i32, i32
  }
}

</mosaic_0001>

<bundles_post_ra>
// kernel: tpu_custom_call.1
= control target key start
LH: loop header
LB: loop body
LE: loop exit
PB: predicated region body
PF: predicated region fallthrough
CT: control target
= control target key end

     0   :  { %9 = vsyncpa [#allocation5], 0  ;;  %s882_s0 = inlined_call_operand.<no memory space> [shape: s32[1], index: 0, kind: input, shape index: {}]   ;;  %s883_s1 = inlined_call_operand.hbm [shape: f32[16,8,128], index: 1, kind: input, shape index: {}]   ;;  %s884_s2 = inlined_call_operand.hbm [shape: f32[16,128], index: 2, kind: input, shape index: {}]   ;;  %s885_s3 = inlined_call_operand.hbm [shape: f32[16,8,128], index: 3, kind: output, shape index: {}]  }
   0x1   :  { %11 = vsyncpa [#allocation5 + $0x1], 0 }
   0x2   :  { %12 = vsyncpa [#allocation8], 0 }
   0x3   :  { %14 = vsyncpa [#allocation8 + $0x1], 0 }
   0x4   :  { %15 = vsyncpa [#allocation6], 0 }
   0x5   :  { %17 = vsyncpa [#allocation6 + $0x1], 0  ;;  %s664_s12 = smov 0   ;;  %s666_s13 = smov 0  }
   0x6   :  { %s668_s0 = smov 0   ;;  %s670_s14 = smov 0  }
   0x7 LB: > { %s685_s15 = sadd.s32 4294967295, %s634_s14   ;;  %s428_s16 = sadd.s32 4294967294, %s634_s14   ;;  %s634_s14 = sphi %s670_s14, %s902_s14   ;;  %s630_s0 = sphi %s668_s0, %s901_s0   ;;  %s626_s13 = sphi %s666_s13, %s900_s13   ;;  %s622_s12 = sphi %s664_s12, %s899_s12  }
   0x8   : > { %s689_s17 = sadd.s32 1, %s634_s14   ;;  %s30_s18 = sadd.s32 1, %s630_s0 }
   0x9   : > { %s27_s19 = ssub.s32 %s634_s14, %s689_s17  ;;  %p37_p0 = scmp.ne.s32.totalorder %s630_s0, %s626_s13 }
   0xa   : > { %p28_p1 = scmp.eq.s32.totalorder %s27_s19, 0  ;;  %p38_p2 = scmp.eq.s32.totalorder %s634_s14, 0 }
   0xb   : > { %p43_p3 = scmp.ne.s32.totalorder %s626_s13, %s622_s12  ;;  %p44_p4 = scmp.eq.s32.totalorder %s685_s15, 0 }
   0xc   : > { %s701_s20 = scalar_select %p28_p1, %s630_s0, %s30_s18  }
   0xd   : > { %p703_p5 = por %p38_p2, %p37_p0  ;;  %p707_p6 = por %p44_p4, %p43_p3 }
   0xe   : > { %p93_p7 = scmp.eq.s32.totalorder %s685_s15, 1  ;;  %p99_p8 = scmp.eq.s32.totalorder %s428_s16, 1 }
   0xf   : > { %s889_s22 = scalar_select %p707_p6, 1, 0 }
  0x10   : > { %p464_p10 = scmp.lt.s32.totalorder %s634_s14, 2  ;;  %p714_p11 = por %p93_p7, %p37_p0 }
  0x11   : > { %p718_p12 = por %p99_p8, %p43_p3  ;;  %s723_s25 = sand.u32 1, %s630_s0  }
  0x12   : > { %s890_s23 = scalar_select %p714_p11, 1, 0 }
  0x13   : > { %s891_s24 = scalar_select %p718_p12, 1, 0 }
  0x14   : > { %s445_s26 = sshll.u32 %s634_s14, 10  ;;  %s431_s27 = sshll.u32 %s723_s25, 6 }
  0x15   : > { %s730_s30 = scalar_lea.hbm %s883_s1, %s445_s26  ;;  %s123_s4 = scalar_lea.vmem [#allocation4], %s431_s27 }
  0x16   : > { %s130_s5 = sshll.u32 %s123_s4, 4  ;;  %p734_p13 = pnand %p464_p10, %p703_p5  ;;  %s738_s5 = int_to_ptr.vmem [resolvable:$true] %s130_s5 }
  0x17   : > { %s120_s7 = scalar_lea.sflag [#allocation5], %s723_s25  ;;  %s504_s8 = scalar_lea.hbm %s730_s30, 1024 }
  0x18   : > { %p505_p0 = scmp.ne.s32.totalorder %s730_s30, %s504_s8  ;;  %p506_p1 = pneg %p734_p13 }
  0x19   : > { %s509_s11 = scalar_lea.hbm %s883_s1, 2048  ;;  %p510_p4 = scmp.lt.u32.totalorder %s730_s30, %s883_s1 }
  0x1a   : > { %p507_p2 = pnand %p506_p1, %p505_p0  ;;  %p511_p5 = scmp.lt.u32.totalorder %s509_s11, %s504_s8 }
  0x1b   : > { %p513_p8 = scmp.lt.u32.totalorder %s504_s8, %s730_s30 }
  0x1c   : > { %p508_p3 = pneg %p507_p2  ;;  %p512_p7 = por %p511_p5, %p510_p4 }
  0x1e   : > { %p514_p10 = por %p513_p8, %p512_p7 }
  0x20   : > { %p515_p9 = pnand %p514_p10, %p508_p3 }
  0x22   : > { %518 = shalt.err (!%p515_p9)
}
  0x23   : > { %s519_s19 = scalar_lea.vmem %s738_s5, 1024  ;;  %s636_s21 = smov [#allocation4]  }
  0x24   : > { %p520_p0 = scmp.ne.s32.totalorder %s738_s5, %s519_s19  ;;  %s524_s26 = sshll.u32 %s636_s21, 4  ;;  %s525_s26 = int_to_ptr.vmem [resolvable:$false] %s524_s26 }
  0x25   : > { %s526_s27 = scalar_lea.vmem %s525_s26, 2048  ;;  %p527_p11 = scmp.lt.s32.totalorder %s738_s5, %s525_s26 }
  0x26   : > { %p522_p2 = pnand %p520_p0, %p506_p1  ;;  %p528_p4 = scmp.lt.s32.totalorder %s526_s27, %s519_s19 }
  0x28   : > { %p523_p12 = pneg %p522_p2  ;;  %p529_p5 = por %p528_p4, %p527_p11 }
  0x2a   : > { %p530_p7 = pnand %p529_p5, %p523_p12 }
  0x2c   : > { %533 = shalt.err (!%p530_p7)
}
  0x2d   : > { %s637_s28 = smov 128   ;;  %s638_s29 = smov 8  }
  0x2e   : > { %456 = dma.hbm_to_vmem [thread:$0]  (!%p734_p13), %s730_s30, 1024, %s738_s5, %s120_s7, %s637_s28, %s637_s28, %s638_s29  }
  0x2f   : > { %p436_p9 = scmp.ge.s32.totalorder %s634_s14, 1  ;;  %p156_p3 = scmp.lt.s32.totalorder %s634_s14, 3 }
  0x30   : > { %s434_s4 = sshll.u32 %s723_s25, 3  ;;  %s435_s9 = sshll.u32 %s634_s14, 7 }
  0x31   : > { %p771_p11 = pnand %p436_p9, %p156_p3  ;;  %s144_s10 = scalar_lea.vmem [#allocation7], %s434_s4 }
  0x32   : > { %s151_s11 = sshll.u32 %s144_s10, 4  ;;  %s779_s19 = scalar_lea.hbm %s884_s2, %s435_s9  ;;  %s152_s11 = int_to_ptr.vmem [resolvable:$true] %s151_s11 }
  0x33   : > { %s893_s8 = scalar_select %p771_p11, 1, 0 }
  0x34   : > { %s141_s30 = scalar_lea.sflag [#allocation8], %s723_s25  ;;  %s534_s5 = scalar_lea.hbm %s779_s19, 128 }
  0x35   : > { %p535_p12 = scmp.ne.s32.totalorder %s779_s19, %s534_s5  ;;  %s539_s26 = scalar_lea.hbm %s884_s2, 256 }
  0x36   : > { %p540_p0 = scmp.lt.u32.totalorder %s779_s19, %s884_s2  ;;  %p541_p2 = scmp.lt.u32.totalorder %s539_s26, %s534_s5 }
  0x37   : > { %p537_p8 = pnand %p535_p12, %p506_p1  ;;  %p543_p5 = scmp.lt.u32.totalorder %s534_s5, %s779_s19 }
  0x38   : > { %p542_p4 = por %p541_p2, %p540_p0 }
  0x39   : > { %p538_p10 = pneg %p537_p8 }
  0x3a   : > { %p544_p7 = por %p543_p5, %p542_p4 }
  0x3c   : > { %p545_p9 = pnand %p544_p7, %p538_p10 }
  0x3e   : > { %548 = shalt.err (!%p545_p9)
}
  0x3f   : > { %s549_s25 = scalar_lea.vmem %s152_s11, 128  ;;  %s639_s29 = smov [#allocation7]  }
  0x40   : > { %p550_p3 = scmp.ne.s32.totalorder %s152_s11, %s549_s25  ;;  %s554_s4 = sshll.u32 %s639_s29, 4  ;;  %s555_s4 = int_to_ptr.vmem [resolvable:$false] %s554_s4 }
  0x41   : > { %s556_s9 = scalar_lea.vmem %s555_s4, 256  ;;  %p557_p6 = scmp.lt.s32.totalorder %s152_s11, %s555_s4 }
  0x42   : > { %p552_p12 = pnand %p550_p3, %p506_p1  ;;  %p558_p11 = scmp.lt.s32.totalorder %s556_s9, %s549_s25 }
  0x44   : > { %p553_p8 = pneg %p552_p12  ;;  %p559_p0 = por %p558_p11, %p557_p6 }
  0x46   : > { %p560_p2 = pnand %p559_p0, %p553_p8 }
  0x48   : > { %563 = shalt.err (!%p560_p2)
}
  0x49   : > { %459 = dma.hbm_to_vmem [thread:$0]  (!%p734_p13), %s779_s19, 128, %s152_s11, %s141_s30  }
  0x4a   : > { %p894_p10 = scmp.ne.s32.totalorder %s893_s8, 0 }
  0x4b   : > { %s804_s10 = sand.u32 (!%p894_p10), 1, %s626_s13   ;;  %p895_p6 = scmp.ne.s32.totalorder (!%p894_p10), %s889_s22, 0 }
  0x4c   : > { %160 = sbr.rel (%p894_p10) target bundleno = 122 (0x7a), region = 28  ;;  %s437_s16 = sshll.u32 (!%p894_p10), %s804_s10, 6 }
  0x4d   : > { %s163_s18 = scalar_lea.sflag (!%p894_p10), [#allocation5], %s804_s10  ;;  %s810_s5 = scalar_lea.vmem (!%p894_p10), [#allocation4], %s437_s16 }
  0x53   : > { %609 = dma.done.wait (%p895_p6), %s163_s18, 1024  }
  0x54   : > { %611 = vsyncadd (%p895_p6), %s163_s18, 4294966272  ;;  %s438_s6 = sshll.u32 %s804_s10, 3  ;;  %s172_s8 = scalar_lea.sflag [#allocation8], %s804_s10 }
  0x55   : > { %s175_s11 = scalar_lea.vmem [#allocation7], %s438_s6 }
  0x56   : > { %613 = dma.done.wait (%p895_p6), %s172_s8, 128  }
  0x57   : > { %615 = vsyncadd (%p895_p6), %s172_s8, 4294967168  ;;  %v209_v0 = vlaneseq  ;;  %v640_v1 = vmov 1966171168   ;;  %v203_v6 = vld [vmem:[%s175_s11] sm:$0xff]  ;;  %v256_v19 = vld [vmem:[%s810_s5 + $0x10] sm:$0xff]  ;;  %s200_s22 = scalar_lea.vmem [#allocation9], %s437_s16 }
  0x58   : > { %v207_v2 = vunpack.c.l.s4 %v640_v1  ;;  %v205_v9 = vcombine.high %v203_v6, %v203_v6  ;;  %v254_v13 = vld [vmem:[%s810_s5] sm:$0xff]  ;;  %v255_v18 = vld [vmem:[%s810_s5 + $0x8] sm:$0xff]  ;;  %v257_v26 = vld [vmem:[%s810_s5 + $0x18] sm:$0xff]  ;;  %s332_s19 = sshll.u32 %s200_s22, 4  ;;  %s446_s30 = sshll.u32 %s685_s15, 10  ;;  %s833_s19 = int_to_ptr.vmem [resolvable:$true] %s332_s19 }
  0x59   : > { %v210_v3 = vshrl.u32 %v209_v0, 7  ;;  %v258_v25 = vld [vmem:[%s810_s5 + $0x20] sm:$0xff]  ;;  %v259_v33 = vld [vmem:[%s810_s5 + $0x28] sm:$0xff]  ;;  %v260_v34 = vld [vmem:[%s810_s5 + $0x30] sm:$0xff]  ;;  %s838_s15 = scalar_lea.hbm %s885_s3, %s446_s30  ;;  %s319_s26 = scalar_lea.sflag [#allocation6], %s804_s10 }
  0x5a   : > { %v208_v4 = vunpack.c.0.s8 %v207_v2  ;;  %v261_v40 = vld [vmem:[%s810_s5 + $0x38] sm:$0xff]  ;;  %s564_s27 = scalar_lea.vmem %s833_s19, 1024  ;;  %p896_p1 = scmp.ne.s32.totalorder %s890_s23, 0 }
  0x5b   : > { %v264_v8 = vsub.s32 0, %v210_v3  ;;  %p565_p13 = scmp.ne.s32.totalorder %s833_s19, %s564_s27  ;;  %s641_s28 = smov [#allocation9]  }
  0x5c   : > { %v211_v5 = vsub.s32 %v208_v4, %v210_v3  ;;  %s568_s25 = sshll.u32 %s641_s28, 4  ;;  %s569_s25 = int_to_ptr.vmem [resolvable:$false] %s568_s25 }
  0x5d   : > { %p566_p11 = pnand %p565_p13, %p896_p1  ;;  %s570_s29 = scalar_lea.vmem %s569_s25, 2048 }
  0x5e   : > { %v212_v7 = vrot.slane %v203_v6, %v211_v5  ;;  %v219_v12 = vrot.slane %v205_v9, %v211_v5  ;;  %p571_p5 = scmp.lt.s32.totalorder %s833_s19, %s569_s25  ;;  %p572_p7 = scmp.lt.s32.totalorder %s570_s29, %s564_s27 }
  0x5f   : > { %p567_p4 = pneg %p566_p11 }
  0x60   : > { %v228_v10 = vrot.slane %v212_v7, %v211_v5  ;;  %v220_v11 = vcombine.high %v212_v7, %v212_v7  ;;  %v235_v17 = vrot.slane %v219_v12, %v211_v5  ;;  %v221_v20 = vcombine.high %v219_v12, %v219_v12  ;;  %p573_p9 = por %p572_p7, %p571_p5 }
  0x62   : > { %v265_v14 = vrot.slane %v228_v10, %v264_v8  ;;  %v242_v15 = vrot.slane %v220_v11, %v211_v5  ;;  %v250_v16 = vcombine.high %v228_v10, %v228_v10  ;;  %v281_v27 = vrot.slane %v235_v17, %v264_v8  ;;  %p574_p3 = pnand %p573_p9, %p567_p4 }
  0x63   : > { %v249_v28 = vrot.slane %v221_v20, %v211_v5  ;;  %v251_v29 = vcombine.high %v235_v17, %v235_v17 }
  0x64   : > { %v302_v21 = vadd.f32 %v265_v14, %v254_v13  ;;  %v269_v22 = vrot.slane %v242_v15, %v264_v8  ;;  %v273_v23 = vrot.slane %v250_v16, %v264_v8  ;;  %v252_v24 = vcombine.high %v242_v15, %v242_v15 }
  0x65   : > { %v306_v35 = vadd.f32 %v281_v27, %v258_v25  ;;  %v285_v36 = vrot.slane %v249_v28, %v264_v8  ;;  %v289_v37 = vrot.slane %v251_v29, %v264_v8  ;;  %v253_v38 = vcombine.high %v249_v28, %v249_v28 }
  0x66   : > { %310 = vst [vmem:[%s200_s22] sm:$0xff] %v302_v21  ;;  %v303_v30 = vadd.f32 %v269_v22, %v255_v18  ;;  %v304_v31 = vadd.f32 %v273_v23, %v256_v19  ;;  %v277_v32 = vrot.slane %v252_v24, %v264_v8 }
  0x67   : > { %314 = vst [vmem:[%s200_s22 + $0x20] sm:$0xff] %v306_v35  ;;  %v307_v41 = vadd.f32 %v285_v36, %v259_v33  ;;  %v308_v42 = vadd.f32 %v289_v37, %v260_v34  ;;  %v293_v43 = vrot.slane %v253_v38, %v264_v8 }
  0x68   : > { %311 = vst [vmem:[%s200_s22 + $0x8] sm:$0xff] %v303_v30  ;;  %312 = vst [vmem:[%s200_s22 + $0x10] sm:$0xff] %v304_v31  ;;  %v305_v39 = vadd.f32 %v277_v32, %v257_v26 }
  0x69   : > { %315 = vst [vmem:[%s200_s22 + $0x28] sm:$0xff] %v307_v41  ;;  %316 = vst [vmem:[%s200_s22 + $0x30] sm:$0xff] %v308_v42  ;;  %v309_v44 = vadd.f32 %v293_v43, %v261_v40 }
  0x6a   : > { %313 = vst [vmem:[%s200_s22 + $0x18] sm:$0xff] %v305_v39 }
  0x6b   : > { %317 = vst [vmem:[%s200_s22 + $0x38] sm:$0xff] %v309_v44 }
  0x6c   : > { %577 = shalt.err (!%p574_p3)
}
  0x6d   : > { %s578_s4 = scalar_lea.hbm %s838_s15, 1024  ;;  %s582_s18 = scalar_lea.hbm %s885_s3, 2048 }
  0x6e   : > { %p579_p12 = scmp.ne.s32.totalorder %s838_s15, %s578_s4  ;;  %p583_p2 = scmp.lt.u32.totalorder %s838_s15, %s885_s3 }
  0x6f   : > { %p584_p10 = scmp.lt.u32.totalorder %s582_s18, %s578_s4  ;;  %p586_p13 = scmp.lt.u32.totalorder %s578_s4, %s838_s15 }
  0x70   : > { %p580_p8 = pnand %p579_p12, %p896_p1 }
  0x71   : > { %p585_p6 = por %p584_p10, %p583_p2 }
  0x72   : > { %p581_p0 = pneg %p580_p8 }
  0x73   : > { %p587_p11 = por %p586_p13, %p585_p6 }
  0x75   : > { %p588_p4 = pnand %p587_p11, %p581_p0 }
  0x77   : > { %591 = shalt.err (!%p588_p4)
}
  0x78   : > { %s642_s8 = smov 128   ;;  %s643_s11 = smov 8  }
  0x79   : > { %451 = dma.vmem_to_hbm [thread:$0]  (%p896_p1), %s833_s19, 1024, %s838_s15, %s319_s26, %s642_s8, %s642_s8, %s643_s11  }
  0x7a PF: > { %s347_s22 = sand.u32 1, %s622_s12   ;;  %p897_p5 = scmp.ne.s32.totalorder %s891_s24, 0 }
  0x7b   : > { %p898_p7 = scmp.ge.s32.totalorder %s634_s14, 2  ;;  %s348_s30 = scalar_lea.sflag [#allocation6], %s347_s22 }
  0x7d   : > { %p461_p9 = pnand %p898_p7, %p897_p5 }
  0x7f   : > { %617 = dma.done.wait (!%p461_p9), %s348_s30, 1024  }
  0x80   : > { %619 = vsyncadd (!%p461_p9), %s348_s30, 4294966272  ;;  %p20_p3 = scmp.ge.s32.totalorder %s689_s17, 4   ;;  %s899_s12 = smov %s626_s13 }
  0x81   : > { %s900_s13 = smov %s630_s0  ;;  %s901_s0 = smov %s701_s20 }
  0x82   : > { %s902_s14 = smov %s689_s17  ;;  %22 = sbr.rel (!%p20_p3) target bundleno = 7 (0x7), region = 86 }
  0x89   :  { %353 = vsyncpa [#allocation5], 1 }
  0x8a   :  { %355 = vsyncpa [#allocation5 + $0x1], 1 }
  0x8b   :  { %356 = vsyncpa [#allocation8], 1 }
  0x8c   :  { %358 = vsyncpa [#allocation8 + $0x1], 1 }
  0x8d   :  { %359 = vsyncpa [#allocation6], 1 }
  0x8e   :  { %361 = vsyncpa [#allocation6 + $0x1], 1 }

</bundles_post_ra>
